<compile_context>
chip_gen: v6e
topology: v6e:2x2x1
jax: 0.10.0
libtpu: 0.0.40
codegen_flags: <defaults>
</compile_context>

<pallas_src>
import functools

import jax
import jax.numpy as jnp
from jax.experimental import pallas as pl
from jax.experimental.pallas import tpu as pltpu

CLASSES_NUM = 3
NOOBJ_SCALE = 1.0   # present in the torch module but unused by its forward
COORD_SCALE = 2.0

LANES = 128         # vreg lane width

# pred feature rows   (per anchor a in {0,1}, base = 6*a):
#   +0 offset, +1 duration, +2 confidence, +3..+5 class logits
# target feature rows (base = 4*a):
#   +0 confidence, +1 class id, +2 offset, +3 duration


def _cdiv(a, b):
    return -(-a // b)


def _round_up(a, m):
    return _cdiv(a, m) * m


def _softplus_abs(x):
    # stable softplus(x) = max(x, 0) + log1p(exp(-|x|))
    return jnp.maximum(x, 0.0) + jnp.log1p(jnp.exp(-jnp.abs(x)))


def _bce_with_logits(x, y):
    # matches F.binary_cross_entropy_with_logits(..., reduction='none')
    return _softplus_abs(x) - x * y


def _tpu_config():
    """Best-effort generation-aware (nsplit, max_tile_s, vmem_limit_bytes)."""
    nsplit = 1                      # 1 TensorCore (v5e / v6e) by default
    max_tile_s = 1024               # safe on every generation (v7x: 64 MiB VMEM)
    vmem_limit = 32 * 1024 * 1024
    vmem_cap = None
    try:
        info = pltpu.get_tpu_info()
        vmem_cap = getattr(info, "vmem_capacity_bytes", None)
        for attr in ("num_cores", "core_count", "num_tensorcores",
                     "tensorcore_count"):
            v = getattr(info, attr, None)
            if v is not None and int(v) > 1:
                nsplit = 2          # multi-TensorCore chip -> megacore split
                break
    except Exception:
        pass
    try:
        kind = jax.devices()[0].device_kind.lower()
        if "v7" in kind or "7x" in kind:
            nsplit = max(nsplit, 2)  # v7x: 2 TensorCores per chip
    except Exception:
        pass
    try:
        # only single-TC big-VMEM chips (v5e/v6e, 128 MiB) get the 2048 tiles
        if nsplit == 1 and vmem_cap is not None and \
                int(vmem_cap) >= 100 * 1024 * 1024:
            max_tile_s = 2048
            vmem_limit = 64 * 1024 * 1024
    except Exception:
        pass
    return nsplit, max_tile_s, vmem_limit


def _detect_loss_kernel(pred_ref, tgt_ref, out_ref):
    """Grid = (split, tile).  pred_ref: (12, tile_s, 128), tgt_ref: (8, tile_s, 128).

    out_ref's block index (c, 0, 0) is constant along the reduction axis, so
    the (1, 8, 128) block stays resident in VMEM and acts as the accumulator
    (no scratch, no finalize copy).  Rows 0..3 hold per-lane partial sums of
    [conf-BCE, cls-BCE, IoU, num_obj]; rows 4..7 stay zero.
    """
    @pl.when(pl.program_id(1) == 0)
    def _init():
        out_ref[...] = jnp.zeros_like(out_ref)

    conf_r = cls_r = iou_r = obj_r = None
    for a in (0, 1):                         # two anchors, static unroll
        p_off = pred_ref[6 * a + 0].astype(jnp.float32)
        p_dur = pred_ref[6 * a + 1].astype(jnp.float32)
        p_conf = pred_ref[6 * a + 2].astype(jnp.float32)
        p_c0 = pred_ref[6 * a + 3].astype(jnp.float32)
        p_c1 = pred_ref[6 * a + 4].astype(jnp.float32)
        p_c2 = pred_ref[6 * a + 5].astype(jnp.float32)
        g_conf = tgt_ref[4 * a + 0].astype(jnp.float32)
        g_cls = tgt_ref[4 * a + 1].astype(jnp.float32)
        g_off = tgt_ref[4 * a + 2].astype(jnp.float32)
        g_dur = tgt_ref[4 * a + 3].astype(jnp.float32)

        is_obj = g_conf > 0.0
        obj = jnp.where(is_obj, 1.0, 0.0)

        # Zero-padded cells contribute exactly ln(2) per anchor here (fixed
        # analytically in the wrapper) and exactly 0 to every other sum, so
        # no per-cell validity mask / iota is needed.
        conf_bce = _bce_with_logits(p_conf, g_conf)

        # class BCE vs one-hot(gt_cls); only the gt class contributes -x
        sp_sum = (_softplus_abs(p_c0) + _softplus_abs(p_c1)
                  + _softplus_abs(p_c2))
        x_gt = jnp.where(g_cls < 0.5, p_c0,
                         jnp.where(g_cls < 1.5, p_c1, p_c2))
        cls_bce = (sp_sum - x_gt) * obj

        # 1-D IoU.  The reference shifts both boxes by the same grid index;
        # IoU is invariant under a common translation, so `grids` drops out.
        lb = jnp.maximum(g_off - 0.5 * g_dur, p_off - 0.5 * p_dur)
        rb = jnp.minimum(g_off + 0.5 * g_dur, p_off + 0.5 * p_dur)
        inter = jnp.maximum(0.0, rb - lb)
        iou = jnp.where(is_obj, inter / (g_dur + p_dur - inter + 1e-6), 0.0)

        # Sublane (XLU) reduction per anchor, straight to per-lane partials:
        # no full-tile accumulators are kept live across the anchor loop.
        cr = jnp.sum(conf_bce, axis=0, keepdims=True)
        kr = jnp.sum(cls_bce, axis=0, keepdims=True)
        ir = jnp.sum(iou, axis=0, keepdims=True)
        orow = jnp.sum(obj, axis=0, keepdims=True)
        if conf_r is None:
            conf_r, cls_r, iou_r, obj_r = cr, kr, ir, orow
        else:
            conf_r += cr
            cls_r += kr
            iou_r += ir
            obj_r += orow

    out_ref[0, 0:1, :] += conf_r
    out_ref[0, 1:2, :] += cls_r
    out_ref[0, 2:3, :] += iou_r
    out_ref[0, 3:4, :] += obj_r


def _detect_loss_impl(pred, target, *, compute_dtype=jnp.bfloat16):
    """pred: (B, G, 12), target: (B, G, 8) -> scalar f32 loss."""
    pred = jnp.asarray(pred)
    target = jnp.asarray(target)
    B, G, PF = pred.shape
    TF = target.shape[-1]
    assert PF == 12 and TF == 8, "expected 12 pred / 8 target features"
    M = B * G                                # number of grid cells

    nsplit, max_tile_s, vmem_limit = _tpu_config()
    s_needed = _cdiv(M, LANES)               # 128-lane rows of grid cells
    if s_needed < 16:
        nsplit = 1                           # no point splitting tiny inputs
    if nsplit == 1 and s_needed <= max_tile_s:
        # single full-extent block (also bypasses sublane divisibility rules)
        tiles_per_split, tile_s = 1, s_needed
    else:
        tiles_total = nsplit * max(1, _cdiv(s_needed, nsplit * max_tile_s))
        # hug s_needed; round to 16 sublanes so bf16 (16,128) tiles stay dense
        tile_s = _round_up(_cdiv(s_needed, tiles_total), 16)
        tiles_per_split = tiles_total // nsplit
    s_total = nsplit * tiles_per_split * tile_s
    m_pad = s_total * LANES

    def to_feature_major(x, f):
        # ONE relayout copy per input: cast + transpose (+ trailing zero pad
        # of the lane-major cell axis) fuse into a single HBM copy under XLA.
        # NOTE: padded cells must be real zeros (the conf-BCE correction and
        # the obj/cls/IoU zero-contribution rely on it).
        x = x.reshape(M, f).astype(compute_dtype).T      # (f, M)
        if m_pad != M:
            x = jnp.pad(x, ((0, 0), (0, m_pad - M)))
        return x.reshape(f, s_total, LANES)

    pred_fm = to_feature_major(pred, PF)
    tgt_fm = to_feature_major(target, TF)

    partials = pl.pallas_call(
        _detect_loss_kernel,
        out_shape=jax.ShapeDtypeStruct((nsplit, 8, LANES), jnp.float32),
        grid=(nsplit, tiles_per_split),
        in_specs=[
            pl.BlockSpec((PF, tile_s, LANES),
                         lambda c, t: (0, c * tiles_per_split + t, 0)),
            pl.BlockSpec((TF, tile_s, LANES),
                         lambda c, t: (0, c * tiles_per_split + t, 0)),
        ],
        out_specs=pl.BlockSpec((1, 8, LANES), lambda c, t: (c, 0, 0)),
        compiler_params=pltpu.CompilerParams(
            dimension_semantics=("parallel", "arbitrary"),
            vmem_limit_bytes=vmem_limit),
    )(pred_fm, tgt_fm)

    # combine per-core / per-lane partials; single exact division by num_obj
    sums = jnp.sum(partials, axis=(0, 2))                # (8,), rows 0..3 used
    # each zero-padded cell contributed softplus(0) = ln(2) per anchor to the
    # conf-BCE sum; subtract it analytically instead of masking in-kernel.
    pad_fix = 2.0 * jnp.log(jnp.float32(2.0)) * jnp.float32(m_pad - M)
    sum_conf = sums[0] - pad_fix
    sum_cls, sum_iou, num_obj = sums[1], sums[2], sums[3]
    # NOTE: num_obj == 0 yields 0/0 = NaN, matching the PyTorch module.
    loss = (sum_conf + sum_cls + COORD_SCALE * (num_obj - sum_iou)) / (
        num_obj * (COORD_SCALE + 2.0))
    return loss


# bf16 slabs (default, halves HBM traffic of relayout + kernel read) and an
# exact-f32 variant that matches the torch forward bit-for-bit in structure.
detect_loss_pallas = jax.jit(
    functools.partial(_detect_loss_impl, compute_dtype=jnp.bfloat16))
detect_loss_pallas_f32 = jax.jit(
    functools.partial(_detect_loss_impl, compute_dtype=jnp.float32))


def detect_loss_reference(pred, target):
    """Plain-JAX mirror of the PyTorch forward (for validation)."""
    pred = pred.astype(jnp.float32)
    target = target.astype(jnp.float32)
    B, G, _ = pred.shape

    pred_conf = pred[:, :, jnp.array([2, 8])].reshape(-1)
    pred_cls = pred[:, :, jnp.array([3, 4, 5, 9, 10, 11])].reshape(-1, 3)
    pred_off = pred[:, :, jnp.array([0, 6])].reshape(-1)
    pred_dur = pred[:, :, jnp.array([1, 7])].reshape(-1)

    gt_conf = target[:, :, jnp.array([0, 4])].reshape(-1)
    gt_cls = target[:, :, jnp.array([1, 5])].reshape(-1).astype(jnp.int32)
    gt_off = target[:, :, jnp.array([2, 6])].reshape(-1)
    gt_dur = target[:, :, jnp.array([3, 7])].reshape(-1)

    grids = jnp.tile(jnp.repeat(jnp.arange(G, dtype=jnp.float32), 2), B)
    obj = (gt_conf > 0).astype(jnp.float32)
    num_obj = jnp.sum(obj)

    conf_loss = jnp.sum(_bce_with_logits(pred_conf, gt_conf)) / num_obj

    onehot = jax.nn.one_hot(gt_cls, CLASSES_NUM, dtype=jnp.float32)
    cls_loss = jnp.sum(
        _bce_with_logits(pred_cls, onehot) * obj[:, None]) / num_obj

    go = gt_off + grids
    po = pred_off + grids
    lb = jnp.maximum(go - 0.5 * gt_dur, po - 0.5 * pred_dur)
    rb = jnp.minimum(go + 0.5 * gt_dur, po + 0.5 * pred_dur)
    inter = jnp.maximum(0.0, rb - lb)
    iou = inter / (gt_dur + pred_dur - inter + 1e-6)
    bbox_loss = (num_obj - jnp.sum(jnp.where(obj > 0, iou, 0.0))) / num_obj

    return (conf_loss + cls_loss + COORD_SCALE * bbox_loss) / (COORD_SCALE + 2.0)


if __name__ == "__main__":
    def make_inputs(key, B, G):
        k1, k2, k3, k4, k5 = jax.random.split(key, 5)
        pred = jax.random.normal(k1, (B, G, 12), dtype=jnp.float32)
        conf = (jax.random.uniform(k2, (B, G, 2)) > 0.5).astype(jnp.float32)
        cls = jax.random.randint(k3, (B, G, 2), 0,
                                 CLASSES_NUM).astype(jnp.float32)
        off = jax.random.uniform(k4, (B, G, 2), dtype=jnp.float32)
        dur = jax.random.uniform(k5, (B, G, 2), minval=0.1, maxval=1.0,
                                 dtype=jnp.float32)
        target = jnp.stack(
            [conf[..., 0], cls[..., 0], off[..., 0], dur[..., 0],
             conf[..., 1], cls[..., 1], off[..., 1], dur[..., 1]], axis=-1)
        # guarantee at least one object anchor (avoids the 0/0 the torch code
        # would also hit with zero objects)
        target = target.at[0, 0, 0].set(1.0)
        return pred, target

    # small shape consistent with the module (grid_num = 10)
    pred_s, target_s = make_inputs(jax.random.PRNGKey(0), B=2, G=10)
    ref_s = jax.block_until_ready(detect_loss_reference(pred_s, target_s))

    out_s_f32 = jax.block_until_ready(detect_loss_pallas_f32(pred_s, target_s))
    assert jnp.allclose(out_s_f32, ref_s, rtol=1e-4, atol=1e-5), (out_s_f32, ref_s)

    out_s_bf16 = jax.block_until_ready(detect_loss_pallas(pred_s, target_s))
    assert jnp.allclose(out_s_bf16, ref_s, rtol=2e-2, atol=2e-3), (out_s_bf16, ref_s)

    # larger shape: exercises the multi-tile reduction axis (and the 2-way
    # parallel split on multi-TensorCore chips)
    pred_l, target_l = make_inputs(jax.random.PRNGKey(1), B=32768, G=10)
    ref_l = jax.block_until_ready(detect_loss_reference(pred_l, target_l))

    out_l_f32 = jax.block_until_ready(detect_loss_pallas_f32(pred_l, target_l))
    assert jnp.allclose(out_l_f32, ref_l, rtol=1e-3, atol=1e-4), (out_l_f32, ref_l)

    out_l_bf16 = jax.block_until_ready(detect_loss_pallas(pred_l, target_l))
    assert jnp.allclose(out_l_bf16, ref_l, rtol=2e-2, atol=2e-3), (out_l_bf16, ref_l)

    print("KERNEL_OK")
</pallas_src>

<mosaic_0001>
module attributes {stable_mosaic.version = 11 : i64} {
  func.func @_detect_loss_kernel(%arg0: i32, %arg1: i32, %arg2: memref<12x1x128xf32, #tpu.memory_space<vmem>>, %arg3: memref<8x1x128xf32, #tpu.memory_space<vmem>>, %arg4: memref<1x8x128xf32, #tpu.memory_space<vmem>>) attributes {dimension_semantics = [#tpu.dimension_semantics<parallel>, #tpu.dimension_semantics<arbitrary>], iteration_bounds = array<i64: 1, 1>, scalar_prefetch = 0 : i64, scratch_operands = 0 : i64, tpu.core_type = #tpu.core_type<tc>, window_params = [{transform_indices = @transform_0, window_bounds = array<i64: 12, 1, 128>}, {transform_indices = @transform_1, window_bounds = array<i64: 8, 1, 128>}, {transform_indices = @transform_2, window_bounds = array<i64: 1, 8, 128>}]} {
    %c0_i32 = arith.constant 0 : i32
    %0 = arith.cmpi eq, %arg1, %c0_i32 : i32
    %1 = arith.extui %0 : i1 to i32
    %c0_i32_0 = arith.constant 0 : i32
    %2 = arith.cmpi ne, %1, %c0_i32_0 : i32
    scf.if %2 {
      %cst_120 = arith.constant 0.000000e+00 : f32
      %233 = vector.broadcast %cst_120 : f32 to vector<1x8x128xf32>
      %c0_121 = arith.constant 0 : index
      %c0_122 = arith.constant 0 : index
      %c0_123 = arith.constant 0 : index
      %234 = vector.load %arg4[%c0_121, %c0_122, %c0_123] : memref<1x8x128xf32, #tpu.memory_space<vmem>>, vector<1x8x128xf32>
      tpu.vector_store %arg4[%c0_121, %c0_122, %c0_123], %233 {strides = array<i32>} : memref<1x8x128xf32, #tpu.memory_space<vmem>>, vector<1x8x128xf32>,
    } else {
    }
    %c0 = arith.constant 0 : index
    %c0_1 = arith.constant 0 : index
    %c0_2 = arith.constant 0 : index
    %3 = vector.load %arg2[%c0, %c0_1, %c0_2] : memref<12x1x128xf32, #tpu.memory_space<vmem>>, vector<1x1x128xf32>
    %4 = vector.shape_cast %3 : vector<1x1x128xf32> to vector<1x128xf32>
    %c1 = arith.constant 1 : index
    %c0_3 = arith.constant 0 : index
    %c0_4 = arith.constant 0 : index
    %5 = vector.load %arg2[%c1, %c0_3, %c0_4] : memref<12x1x128xf32, #tpu.memory_space<vmem>>, vector<1x1x128xf32>
    %6 = vector.shape_cast %5 : vector<1x1x128xf32> to vector<1x128xf32>
    %c2 = arith.constant 2 : index
    %c0_5 = arith.constant 0 : index
    %c0_6 = arith.constant 0 : index
    %7 = vector.load %arg2[%c2, %c0_5, %c0_6] : memref<12x1x128xf32, #tpu.memory_space<vmem>>, vector<1x1x128xf32>
    %8 = vector.shape_cast %7 : vector<1x1x128xf32> to vector<1x128xf32>
    %c3 = arith.constant 3 : index
    %c0_7 = arith.constant 0 : index
    %c0_8 = arith.constant 0 : index
    %9 = vector.load %arg2[%c3, %c0_7, %c0_8] : memref<12x1x128xf32, #tpu.memory_space<vmem>>, vector<1x1x128xf32>
    %10 = vector.shape_cast %9 : vector<1x1x128xf32> to vector<1x128xf32>
    %c4 = arith.constant 4 : index
    %c0_9 = arith.constant 0 : index
    %c0_10 = arith.constant 0 : index
    %11 = vector.load %arg2[%c4, %c0_9, %c0_10] : memref<12x1x128xf32, #tpu.memory_space<vmem>>, vector<1x1x128xf32>
    %12 = vector.shape_cast %11 : vector<1x1x128xf32> to vector<1x128xf32>
    %c5 = arith.constant 5 : index
    %c0_11 = arith.constant 0 : index
    %c0_12 = arith.constant 0 : index
    %13 = vector.load %arg2[%c5, %c0_11, %c0_12] : memref<12x1x128xf32, #tpu.memory_space<vmem>>, vector<1x1x128xf32>
    %14 = vector.shape_cast %13 : vector<1x1x128xf32> to vector<1x128xf32>
    %c0_13 = arith.constant 0 : index
    %c0_14 = arith.constant 0 : index
    %c0_15 = arith.constant 0 : index
    %15 = vector.load %arg3[%c0_13, %c0_14, %c0_15] : memref<8x1x128xf32, #tpu.memory_space<vmem>>, vector<1x1x128xf32>
    %16 = vector.shape_cast %15 : vector<1x1x128xf32> to vector<1x128xf32>
    %c1_16 = arith.constant 1 : index
    %c0_17 = arith.constant 0 : index
    %c0_18 = arith.constant 0 : index
    %17 = vector.load %arg3[%c1_16, %c0_17, %c0_18] : memref<8x1x128xf32, #tpu.memory_space<vmem>>, vector<1x1x128xf32>
    %18 = vector.shape_cast %17 : vector<1x1x128xf32> to vector<1x128xf32>
    %c2_19 = arith.constant 2 : index
    %c0_20 = arith.constant 0 : index
    %c0_21 = arith.constant 0 : index
    %19 = vector.load %arg3[%c2_19, %c0_20, %c0_21] : memref<8x1x128xf32, #tpu.memory_space<vmem>>, vector<1x1x128xf32>
    %20 = vector.shape_cast %19 : vector<1x1x128xf32> to vector<1x128xf32>
    %c3_22 = arith.constant 3 : index
    %c0_23 = arith.constant 0 : index
    %c0_24 = arith.constant 0 : index
    %21 = vector.load %arg3[%c3_22, %c0_23, %c0_24] : memref<8x1x128xf32, #tpu.memory_space<vmem>>, vector<1x1x128xf32>
    %22 = vector.shape_cast %21 : vector<1x1x128xf32> to vector<1x128xf32>
    %cst = arith.constant 0.000000e+00 : f32
    %23 = vector.broadcast %cst : f32 to vector<1x128xf32>
    %24 = arith.cmpf ogt, %16, %23 : vector<1x128xf32>
    %cst_25 = arith.constant 1.000000e+00 : f32
    %cst_26 = arith.constant 0.000000e+00 : f32
    %25 = vector.broadcast %cst_25 : f32 to vector<1x128xf32>
    %26 = vector.broadcast %cst_26 : f32 to vector<1x128xf32>
    %27 = arith.select %24, %25, %26 : vector<1x128xi1>, vector<1x128xf32>
    %cst_27 = arith.constant 0.000000e+00 : f32
    %28 = vector.broadcast %cst_27 : f32 to vector<1x128xf32>
    %29 = arith.maximumf %8, %28 : vector<1x128xf32>
    %30 = math.absf %8 : vector<1x128xf32>
    %cst_28 = arith.constant 0.000000e+00 : f32
    %31 = vector.broadcast %cst_28 : f32 to vector<1x128xf32>
    %32 = arith.subf %31, %30 : vector<1x128xf32>
    %33 = math.exp %32 : vector<1x128xf32>
    %34 = math.log1p %33 : vector<1x128xf32>
    %35 = arith.addf %29, %34 : vector<1x128xf32>
    %36 = arith.mulf %8, %16 : vector<1x128xf32>
    %37 = arith.subf %35, %36 : vector<1x128xf32>
    %cst_29 = arith.constant 0.000000e+00 : f32
    %38 = vector.broadcast %cst_29 : f32 to vector<1x128xf32>
    %39 = arith.maximumf %10, %38 : vector<1x128xf32>
    %40 = math.absf %10 : vector<1x128xf32>
    %cst_30 = arith.constant 0.000000e+00 : f32
    %41 = vector.broadcast %cst_30 : f32 to vector<1x128xf32>
    %42 = arith.subf %41, %40 : vector<1x128xf32>
    %43 = math.exp %42 : vector<1x128xf32>
    %44 = math.log1p %43 : vector<1x128xf32>
    %45 = arith.addf %39, %44 : vector<1x128xf32>
    %cst_31 = arith.constant 0.000000e+00 : f32
    %46 = vector.broadcast %cst_31 : f32 to vector<1x128xf32>
    %47 = arith.maximumf %12, %46 : vector<1x128xf32>
    %48 = math.absf %12 : vector<1x128xf32>
    %cst_32 = arith.constant 0.000000e+00 : f32
    %49 = vector.broadcast %cst_32 : f32 to vector<1x128xf32>
    %50 = arith.subf %49, %48 : vector<1x128xf32>
    %51 = math.exp %50 : vector<1x128xf32>
    %52 = math.log1p %51 : vector<1x128xf32>
    %53 = arith.addf %47, %52 : vector<1x128xf32>
    %54 = arith.addf %45, %53 : vector<1x128xf32>
    %cst_33 = arith.constant 0.000000e+00 : f32
    %55 = vector.broadcast %cst_33 : f32 to vector<1x128xf32>
    %56 = arith.maximumf %14, %55 : vector<1x128xf32>
    %57 = math.absf %14 : vector<1x128xf32>
    %cst_34 = arith.constant 0.000000e+00 : f32
    %58 = vector.broadcast %cst_34 : f32 to vector<1x128xf32>
    %59 = arith.subf %58, %57 : vector<1x128xf32>
    %60 = math.exp %59 : vector<1x128xf32>
    %61 = math.log1p %60 : vector<1x128xf32>
    %62 = arith.addf %56, %61 : vector<1x128xf32>
    %63 = arith.addf %54, %62 : vector<1x128xf32>
    %cst_35 = arith.constant 5.000000e-01 : f32
    %64 = vector.broadcast %cst_35 : f32 to vector<1x128xf32>
    %65 = arith.cmpf olt, %18, %64 : vector<1x128xf32>
    %cst_36 = arith.constant 1.500000e+00 : f32
    %66 = vector.broadcast %cst_36 : f32 to vector<1x128xf32>
    %67 = arith.cmpf olt, %18, %66 : vector<1x128xf32>
    %68 = arith.select %67, %12, %14 : vector<1x128xi1>, vector<1x128xf32>
    %69 = arith.select %65, %10, %68 : vector<1x128xi1>, vector<1x128xf32>
    %70 = arith.subf %63, %69 : vector<1x128xf32>
    %71 = arith.mulf %70, %27 : vector<1x128xf32>
    %cst_37 = arith.constant 5.000000e-01 : f32
    %72 = vector.broadcast %cst_37 : f32 to vector<1x128xf32>
    %73 = arith.mulf %72, %22 : vector<1x128xf32>
    %74 = arith.subf %20, %73 : vector<1x128xf32>
    %cst_38 = arith.constant 5.000000e-01 : f32
    %75 = vector.broadcast %cst_38 : f32 to vector<1x128xf32>
    %76 = arith.mulf %75, %6 : vector<1x128xf32>
    %77 = arith.subf %4, %76 : vector<1x128xf32>
    %78 = arith.maximumf %74, %77 : vector<1x128xf32>
    %cst_39 = arith.constant 5.000000e-01 : f32
    %79 = vector.broadcast %cst_39 : f32 to vector<1x128xf32>
    %80 = arith.mulf %79, %22 : vector<1x128xf32>
    %81 = arith.addf %20, %80 : vector<1x128xf32>
    %cst_40 = arith.constant 5.000000e-01 : f32
    %82 = vector.broadcast %cst_40 : f32 to vector<1x128xf32>
    %83 = arith.mulf %82, %6 : vector<1x128xf32>
    %84 = arith.addf %4, %83 : vector<1x128xf32>
    %85 = arith.minimumf %81, %84 : vector<1x128xf32>
    %86 = arith.subf %85, %78 : vector<1x128xf32>
    %cst_41 = arith.constant 0.000000e+00 : f32
    %87 = vector.broadcast %cst_41 : f32 to vector<1x128xf32>
    %88 = arith.maximumf %87, %86 : vector<1x128xf32>
    %89 = arith.addf %22, %6 : vector<1x128xf32>
    %90 = arith.subf %89, %88 : vector<1x128xf32>
    %cst_42 = arith.constant 9.99999997E-7 : f32
    %91 = vector.broadcast %cst_42 : f32 to vector<1x128xf32>
    %92 = arith.addf %90, %91 : vector<1x128xf32>
    %93 = arith.divf %88, %92 : vector<1x128xf32>
    %cst_43 = arith.constant 0.000000e+00 : f32
    %94 = vector.broadcast %cst_43 : f32 to vector<1x128xf32>
    %95 = arith.select %24, %93, %94 : vector<1x128xi1>, vector<1x128xf32>
    %cst_44 = arith.constant dense<0.000000e+00> : vector<128xf32>
    %96 = vector.multi_reduction <add>, %37, %cst_44 [0] : vector<1x128xf32> to vector<128xf32>
    %97 = vector.shape_cast %96 : vector<128xf32> to vector<1x128xf32>
    %cst_45 = arith.constant dense<0.000000e+00> : vector<128xf32>
    %98 = vector.multi_reduction <add>, %71, %cst_45 [0] : vector<1x128xf32> to vector<128xf32>
    %99 = vector.shape_cast %98 : vector<128xf32> to vector<1x128xf32>
    %cst_46 = arith.constant dense<0.000000e+00> : vector<128xf32>
    %100 = vector.multi_reduction <add>, %95, %cst_46 [0] : vector<1x128xf32> to vector<128xf32>
    %101 = vector.shape_cast %100 : vector<128xf32> to vector<1x128xf32>
    %cst_47 = arith.constant dense<0.000000e+00> : vector<128xf32>
    %102 = vector.multi_reduction <add>, %27, %cst_47 [0] : vector<1x128xf32> to vector<128xf32>
    %103 = vector.shape_cast %102 : vector<128xf32> to vector<1x128xf32>
    %c6 = arith.constant 6 : index
    %c0_48 = arith.constant 0 : index
    %c0_49 = arith.constant 0 : index
    %104 = vector.load %arg2[%c6, %c0_48, %c0_49] : memref<12x1x128xf32, #tpu.memory_space<vmem>>, vector<1x1x128xf32>
    %105 = vector.shape_cast %104 : vector<1x1x128xf32> to vector<1x128xf32>
    %c7 = arith.constant 7 : index
    %c0_50 = arith.constant 0 : index
    %c0_51 = arith.constant 0 : index
    %106 = vector.load %arg2[%c7, %c0_50, %c0_51] : memref<12x1x128xf32, #tpu.memory_space<vmem>>, vector<1x1x128xf32>
    %107 = vector.shape_cast %106 : vector<1x1x128xf32> to vector<1x128xf32>
    %c8 = arith.constant 8 : index
    %c0_52 = arith.constant 0 : index
    %c0_53 = arith.constant 0 : index
    %108 = vector.load %arg2[%c8, %c0_52, %c0_53] : memref<12x1x128xf32, #tpu.memory_space<vmem>>, vector<1x1x128xf32>
    %109 = vector.shape_cast %108 : vector<1x1x128xf32> to vector<1x128xf32>
    %c9 = arith.constant 9 : index
    %c0_54 = arith.constant 0 : index
    %c0_55 = arith.constant 0 : index
    %110 = vector.load %arg2[%c9, %c0_54, %c0_55] : memref<12x1x128xf32, #tpu.memory_space<vmem>>, vector<1x1x128xf32>
    %111 = vector.shape_cast %110 : vector<1x1x128xf32> to vector<1x128xf32>
    %c10 = arith.constant 10 : index
    %c0_56 = arith.constant 0 : index
    %c0_57 = arith.constant 0 : index
    %112 = vector.load %arg2[%c10, %c0_56, %c0_57] : memref<12x1x128xf32, #tpu.memory_space<vmem>>, vector<1x1x128xf32>
    %113 = vector.shape_cast %112 : vector<1x1x128xf32> to vector<1x128xf32>
    %c11 = arith.constant 11 : index
    %c0_58 = arith.constant 0 : index
    %c0_59 = arith.constant 0 : index
    %114 = vector.load %arg2[%c11, %c0_58, %c0_59] : memref<12x1x128xf32, #tpu.memory_space<vmem>>, vector<1x1x128xf32>
    %115 = vector.shape_cast %114 : vector<1x1x128xf32> to vector<1x128xf32>
    %c4_60 = arith.constant 4 : index
    %c0_61 = arith.constant 0 : index
    %c0_62 = arith.constant 0 : index
    %116 = vector.load %arg3[%c4_60, %c0_61, %c0_62] : memref<8x1x128xf32, #tpu.memory_space<vmem>>, vector<1x1x128xf32>
    %117 = vector.shape_cast %116 : vector<1x1x128xf32> to vector<1x128xf32>
    %c5_63 = arith.constant 5 : index
    %c0_64 = arith.constant 0 : index
    %c0_65 = arith.constant 0 : index
    %118 = vector.load %arg3[%c5_63, %c0_64, %c0_65] : memref<8x1x128xf32, #tpu.memory_space<vmem>>, vector<1x1x128xf32>
    %119 = vector.shape_cast %118 : vector<1x1x128xf32> to vector<1x128xf32>
    %c6_66 = arith.constant 6 : index
    %c0_67 = arith.constant 0 : index
    %c0_68 = arith.constant 0 : index
    %120 = vector.load %arg3[%c6_66, %c0_67, %c0_68] : memref<8x1x128xf32, #tpu.memory_space<vmem>>, vector<1x1x128xf32>
    %121 = vector.shape_cast %120 : vector<1x1x128xf32> to vector<1x128xf32>
    %c7_69 = arith.constant 7 : index
    %c0_70 = arith.constant 0 : index
    %c0_71 = arith.constant 0 : index
    %122 = vector.load %arg3[%c7_69, %c0_70, %c0_71] : memref<8x1x128xf32, #tpu.memory_space<vmem>>, vector<1x1x128xf32>
    %123 = vector.shape_cast %122 : vector<1x1x128xf32> to vector<1x128xf32>
    %cst_72 = arith.constant 0.000000e+00 : f32
    %124 = vector.broadcast %cst_72 : f32 to vector<1x128xf32>
    %125 = arith.cmpf ogt, %117, %124 : vector<1x128xf32>
    %cst_73 = arith.constant 1.000000e+00 : f32
    %cst_74 = arith.constant 0.000000e+00 : f32
    %126 = vector.broadcast %cst_73 : f32 to vector<1x128xf32>
    %127 = vector.broadcast %cst_74 : f32 to vector<1x128xf32>
    %128 = arith.select %125, %126, %127 : vector<1x128xi1>, vector<1x128xf32>
    %cst_75 = arith.constant 0.000000e+00 : f32
    %129 = vector.broadcast %cst_75 : f32 to vector<1x128xf32>
    %130 = arith.maximumf %109, %129 : vector<1x128xf32>
    %131 = math.absf %109 : vector<1x128xf32>
    %cst_76 = arith.constant 0.000000e+00 : f32
    %132 = vector.broadcast %cst_76 : f32 to vector<1x128xf32>
    %133 = arith.subf %132, %131 : vector<1x128xf32>
    %134 = math.exp %133 : vector<1x128xf32>
    %135 = math.log1p %134 : vector<1x128xf32>
    %136 = arith.addf %130, %135 : vector<1x128xf32>
    %137 = arith.mulf %109, %117 : vector<1x128xf32>
    %138 = arith.subf %136, %137 : vector<1x128xf32>
    %cst_77 = arith.constant 0.000000e+00 : f32
    %139 = vector.broadcast %cst_77 : f32 to vector<1x128xf32>
    %140 = arith.maximumf %111, %139 : vector<1x128xf32>
    %141 = math.absf %111 : vector<1x128xf32>
    %cst_78 = arith.constant 0.000000e+00 : f32
    %142 = vector.broadcast %cst_78 : f32 to vector<1x128xf32>
    %143 = arith.subf %142, %141 : vector<1x128xf32>
    %144 = math.exp %143 : vector<1x128xf32>
    %145 = math.log1p %144 : vector<1x128xf32>
    %146 = arith.addf %140, %145 : vector<1x128xf32>
    %cst_79 = arith.constant 0.000000e+00 : f32
    %147 = vector.broadcast %cst_79 : f32 to vector<1x128xf32>
    %148 = arith.maximumf %113, %147 : vector<1x128xf32>
    %149 = math.absf %113 : vector<1x128xf32>
    %cst_80 = arith.constant 0.000000e+00 : f32
    %150 = vector.broadcast %cst_80 : f32 to vector<1x128xf32>
    %151 = arith.subf %150, %149 : vector<1x128xf32>
    %152 = math.exp %151 : vector<1x128xf32>
    %153 = math.log1p %152 : vector<1x128xf32>
    %154 = arith.addf %148, %153 : vector<1x128xf32>
    %155 = arith.addf %146, %154 : vector<1x128xf32>
    %cst_81 = arith.constant 0.000000e+00 : f32
    %156 = vector.broadcast %cst_81 : f32 to vector<1x128xf32>
    %157 = arith.maximumf %115, %156 : vector<1x128xf32>
    %158 = math.absf %115 : vector<1x128xf32>
    %cst_82 = arith.constant 0.000000e+00 : f32
    %159 = vector.broadcast %cst_82 : f32 to vector<1x128xf32>
    %160 = arith.subf %159, %158 : vector<1x128xf32>
    %161 = math.exp %160 : vector<1x128xf32>
    %162 = math.log1p %161 : vector<1x128xf32>
    %163 = arith.addf %157, %162 : vector<1x128xf32>
    %164 = arith.addf %155, %163 : vector<1x128xf32>
    %cst_83 = arith.constant 5.000000e-01 : f32
    %165 = vector.broadcast %cst_83 : f32 to vector<1x128xf32>
    %166 = arith.cmpf olt, %119, %165 : vector<1x128xf32>
    %cst_84 = arith.constant 1.500000e+00 : f32
    %167 = vector.broadcast %cst_84 : f32 to vector<1x128xf32>
    %168 = arith.cmpf olt, %119, %167 : vector<1x128xf32>
    %169 = arith.select %168, %113, %115 : vector<1x128xi1>, vector<1x128xf32>
    %170 = arith.select %166, %111, %169 : vector<1x128xi1>, vector<1x128xf32>
    %171 = arith.subf %164, %170 : vector<1x128xf32>
    %172 = arith.mulf %171, %128 : vector<1x128xf32>
    %cst_85 = arith.constant 5.000000e-01 : f32
    %173 = vector.broadcast %cst_85 : f32 to vector<1x128xf32>
    %174 = arith.mulf %173, %123 : vector<1x128xf32>
    %175 = arith.subf %121, %174 : vector<1x128xf32>
    %cst_86 = arith.constant 5.000000e-01 : f32
    %176 = vector.broadcast %cst_86 : f32 to vector<1x128xf32>
    %177 = arith.mulf %176, %107 : vector<1x128xf32>
    %178 = arith.subf %105, %177 : vector<1x128xf32>
    %179 = arith.maximumf %175, %178 : vector<1x128xf32>
    %cst_87 = arith.constant 5.000000e-01 : f32
    %180 = vector.broadcast %cst_87 : f32 to vector<1x128xf32>
    %181 = arith.mulf %180, %123 : vector<1x128xf32>
    %182 = arith.addf %121, %181 : vector<1x128xf32>
    %cst_88 = arith.constant 5.000000e-01 : f32
    %183 = vector.broadcast %cst_88 : f32 to vector<1x128xf32>
    %184 = arith.mulf %183, %107 : vector<1x128xf32>
    %185 = arith.addf %105, %184 : vector<1x128xf32>
    %186 = arith.minimumf %182, %185 : vector<1x128xf32>
    %187 = arith.subf %186, %179 : vector<1x128xf32>
    %cst_89 = arith.constant 0.000000e+00 : f32
    %188 = vector.broadcast %cst_89 : f32 to vector<1x128xf32>
    %189 = arith.maximumf %188, %187 : vector<1x128xf32>
    %190 = arith.addf %123, %107 : vector<1x128xf32>
    %191 = arith.subf %190, %189 : vector<1x128xf32>
    %cst_90 = arith.constant 9.99999997E-7 : f32
    %192 = vector.broadcast %cst_90 : f32 to vector<1x128xf32>
    %193 = arith.addf %191, %192 : vector<1x128xf32>
    %194 = arith.divf %189, %193 : vector<1x128xf32>
    %cst_91 = arith.constant 0.000000e+00 : f32
    %195 = vector.broadcast %cst_91 : f32 to vector<1x128xf32>
    %196 = arith.select %125, %194, %195 : vector<1x128xi1>, vector<1x128xf32>
    %cst_92 = arith.constant dense<0.000000e+00> : vector<128xf32>
    %197 = vector.multi_reduction <add>, %138, %cst_92 [0] : vector<1x128xf32> to vector<128xf32>
    %198 = vector.shape_cast %197 : vector<128xf32> to vector<1x128xf32>
    %cst_93 = arith.constant dense<0.000000e+00> : vector<128xf32>
    %199 = vector.multi_reduction <add>, %172, %cst_93 [0] : vector<1x128xf32> to vector<128xf32>
    %200 = vector.shape_cast %199 : vector<128xf32> to vector<1x128xf32>
    %cst_94 = arith.constant dense<0.000000e+00> : vector<128xf32>
    %201 = vector.multi_reduction <add>, %196, %cst_94 [0] : vector<1x128xf32> to vector<128xf32>
    %202 = vector.shape_cast %201 : vector<128xf32> to vector<1x128xf32>
    %cst_95 = arith.constant dense<0.000000e+00> : vector<128xf32>
    %203 = vector.multi_reduction <add>, %128, %cst_95 [0] : vector<1x128xf32> to vector<128xf32>
    %204 = vector.shape_cast %203 : vector<128xf32> to vector<1x128xf32>
    %205 = arith.addf %97, %198 : vector<1x128xf32>
    %206 = arith.addf %99, %200 : vector<1x128xf32>
    %207 = arith.addf %101, %202 : vector<1x128xf32>
    %208 = arith.addf %103, %204 : vector<1x128xf32>
    %c0_96 = arith.constant 0 : index
    %c0_97 = arith.constant 0 : index
    %c0_98 = arith.constant 0 : index
    %209 = vector.load %arg4[%c0_96, %c0_97, %c0_98] : memref<1x8x128xf32, #tpu.memory_space<vmem>>, vector<1x1x128xf32>
    %210 = vector.shape_cast %209 : vector<1x1x128xf32> to vector<1x128xf32>
    %211 = arith.addf %210, %205 : vector<1x128xf32>
    %c0_99 = arith.constant 0 : index
    %c0_100 = arith.constant 0 : index
    %c0_101 = arith.constant 0 : index
    %212 = vector.load %arg4[%c0_99, %c0_100, %c0_101] : memref<1x8x128xf32, #tpu.memory_space<vmem>>, vector<1x1x128xf32>
    %213 = vector.shape_cast %212 : vector<1x1x128xf32> to vector<1x128xf32>
    %214 = vector.shape_cast %211 : vector<1x128xf32> to vector<1x1x128xf32>
    tpu.vector_store %arg4[%c0_99, %c0_100, %c0_101], %214 {strides = array<i32>} : memref<1x8x128xf32, #tpu.memory_space<vmem>>, vector<1x1x128xf32>,
    %c0_102 = arith.constant 0 : index
    %c1_103 = arith.constant 1 : index
    %c0_104 = arith.constant 0 : index
    %215 = vector.load %arg4[%c0_102, %c1_103, %c0_104] : memref<1x8x128xf32, #tpu.memory_space<vmem>>, vector<1x1x128xf32>
    %216 = vector.shape_cast %215 : vector<1x1x128xf32> to vector<1x128xf32>
    %217 = arith.addf %216, %206 : vector<1x128xf32>
    %c0_105 = arith.constant 0 : index
    %c1_106 = arith.constant 1 : index
    %c0_107 = arith.constant 0 : index
    %218 = vector.load %arg4[%c0_105, %c1_106, %c0_107] : memref<1x8x128xf32, #tpu.memory_space<vmem>>, vector<1x1x128xf32>
    %219 = vector.shape_cast %218 : vector<1x1x128xf32> to vector<1x128xf32>
    %220 = vector.shape_cast %217 : vector<1x128xf32> to vector<1x1x128xf32>
    tpu.vector_store %arg4[%c0_105, %c1_106, %c0_107], %220 {strides = array<i32>} : memref<1x8x128xf32, #tpu.memory_space<vmem>>, vector<1x1x128xf32>,
    %c0_108 = arith.constant 0 : index
    %c2_109 = arith.constant 2 : index
    %c0_110 = arith.constant 0 : index
    %221 = vector.load %arg4[%c0_108, %c2_109, %c0_110] : memref<1x8x128xf32, #tpu.memory_space<vmem>>, vector<1x1x128xf32>
    %222 = vector.shape_cast %221 : vector<1x1x128xf32> to vector<1x128xf32>
    %223 = arith.addf %222, %207 : vector<1x128xf32>
    %c0_111 = arith.constant 0 : index
    %c2_112 = arith.constant 2 : index
    %c0_113 = arith.constant 0 : index
    %224 = vector.load %arg4[%c0_111, %c2_112, %c0_113] : memref<1x8x128xf32, #tpu.memory_space<vmem>>, vector<1x1x128xf32>
    %225 = vector.shape_cast %224 : vector<1x1x128xf32> to vector<1x128xf32>
    %226 = vector.shape_cast %223 : vector<1x128xf32> to vector<1x1x128xf32>
    tpu.vector_store %arg4[%c0_111, %c2_112, %c0_113], %226 {strides = array<i32>} : memref<1x8x128xf32, #tpu.memory_space<vmem>>, vector<1x1x128xf32>,
    %c0_114 = arith.constant 0 : index
    %c3_115 = arith.constant 3 : index
    %c0_116 = arith.constant 0 : index
    %227 = vector.load %arg4[%c0_114, %c3_115, %c0_116] : memref<1x8x128xf32, #tpu.memory_space<vmem>>, vector<1x1x128xf32>
    %228 = vector.shape_cast %227 : vector<1x1x128xf32> to vector<1x128xf32>
    %229 = arith.addf %228, %208 : vector<1x128xf32>
    %c0_117 = arith.constant 0 : index
    %c3_118 = arith.constant 3 : index
    %c0_119 = arith.constant 0 : index
    %230 = vector.load %arg4[%c0_117, %c3_118, %c0_119] : memref<1x8x128xf32, #tpu.memory_space<vmem>>, vector<1x1x128xf32>
    %231 = vector.shape_cast %230 : vector<1x1x128xf32> to vector<1x128xf32>
    %232 = vector.shape_cast %229 : vector<1x128xf32> to vector<1x1x128xf32>
    tpu.vector_store %arg4[%c0_117, %c3_118, %c0_119], %232 {strides = array<i32>} : memref<1x8x128xf32, #tpu.memory_space<vmem>>, vector<1x1x128xf32>,
    return
  }
  func.func @transform_0(%arg0: i32, %arg1: i32) -> (i32, i32, i32) {
    %c1_i32 = arith.constant 1 : i32
    %0 = arith.muli %arg0, %c1_i32 : i32
    %1 = arith.addi %0, %arg1 : i32
    %c0_i32 = arith.constant 0 : i32
    %c0_i32_0 = arith.constant 0 : i32
    %c0_i32_1 = arith.constant 0 : i32
    return %c0_i32, %1, %c0_i32_0 : i32, i32, i32
  }
  func.func @transform_1(%arg0: i32, %arg1: i32) -> (i32, i32, i32) {
    %c1_i32 = arith.constant 1 : i32
    %0 = arith.muli %arg0, %c1_i32 : i32
    %1 = arith.addi %0, %arg1 : i32
    %c0_i32 = arith.constant 0 : i32
    %c0_i32_0 = arith.constant 0 : i32
    %c0_i32_1 = arith.constant 0 : i32
    return %c0_i32, %1, %c0_i32_0 : i32, i32, i32
  }
  func.func @transform_2(%arg0: i32, %arg1: i32) -> (i32, i32, i32) {
    %c0_i32 = arith.constant 0 : i32
    %c0_i32_0 = arith.constant 0 : i32
    %c0_i32_1 = arith.constant 0 : i32
    return %arg0, %c0_i32, %c0_i32_0 : i32, i32, i32
  }
}

</mosaic_0001>

<bundles_post_ra>
// kernel: _detect_loss_impl.1
= control target key start
LH: loop header
LB: loop body
LE: loop exit
PB: predicated region body
PF: predicated region fallthrough
CT: control target
= control target key end

     0   :  { %v347_v0 = vmov 0.0   ;;  %s644_s0 = inlined_call_operand.vmem [shape: f32[12,1,128], index: 0, kind: input, shape index: {}]   ;;  %s645_s2 = inlined_call_operand.vmem [shape: f32[1,8,128], index: 2, kind: output, shape index: {}]   ;;  %s646_s1 = inlined_call_operand.vmem [shape: f32[8,1,128], index: 1, kind: input, shape index: {}]  }
   0x1   :  { %43 = vst [vmem:[%s645_s2] sm:$0xff] %v347_v0  ;;  %v370_v1 = vld [vmem:[%s644_s0 + $0x2] sm:$0x1]  ;;  %v375_v2 = vld [vmem:[%s644_s0 + $0x3] sm:$0x1]  ;;  %v380_v3 = vld [vmem:[%s644_s0 + $0x4] sm:$0x1] }
   0x2   :  { %v385_v4 = vld [vmem:[%s644_s0 + $0x5] sm:$0x1]  ;;  %v299_v5 = vld [vmem:[%s646_s1 + $0x3] sm:$0x1]  ;;  %v65_v6 = vand.u32 2147483647, %v370_v1 }
   0x3   :  { %v292_v7 = vld [vmem:[%s644_s0 + $0x1] sm:$0x1]  ;;  %v298_v8 = vld [vmem:[%s646_s1 + $0x2] sm:$0x1]  ;;  %v82_v9 = vand.u32 2147483647, %v375_v2 }
   0x4   :  { %v66_v10 = vsub.f32 0.0, %v65_v6  ;;  %v97_v11 = vand.u32 2147483647, %v380_v3  ;;  %v113_v12 = vand.u32 2147483647, %v385_v4  ;;  %v134_v14 = vmul.f32 0.5, %v299_v5 }
   0x5   :  { %v83_v13 = vsub.f32 0.0, %v82_v9  ;;  %v44_v15 = vld [vmem:[%s644_s0] sm:$0x1]  ;;  %v136_v21 = vmul.f32 0.5, %v292_v7  ;;  %v406_v27 = vld [vmem:[%s644_s0 + $0x8] sm:$0x1]  ;;  %v144_v35 = vadd.f32 %v299_v5, %v292_v7 }
   0x6   :  { %v67_v16 = vmul.f32 1.442695, %v66_v10  ;;  %v98_v17 = vsub.f32 0.0, %v97_v11  ;;  %v114_v18 = vsub.f32 0.0, %v113_v12  ;;  %v135_v20 = vsub.f32 %v298_v8, %v134_v14  ;;  %v411_v28 = vld [vmem:[%s644_s0 + $0x9] sm:$0x1] }
   0x7   :  { %v84_v19 = vmul.f32 1.442695, %v83_v13  ;;  %v139_v24 = vadd.f32 %v298_v8, %v134_v14  ;;  %v137_v25 = vsub.f32 %v44_v15, %v136_v21  ;;  %v140_v26 = vadd.f32 %v136_v21, %v44_v15  ;;  %v416_v29 = vld [vmem:[%s644_s0 + $0xa] sm:$0x1]  ;;  %v421_v32 = vld [vmem:[%s644_s0 + $0xb] sm:$0x1] }
   0x8   :  { %311 = vpow2.f32 %v67_v16  ;;  %v99_v22 = vmul.f32 1.442695, %v98_v17  ;;  %v115_v23 = vmul.f32 1.442695, %v114_v18  ;;  %v177_v33 = vand.u32 2147483647, %v406_v27 }
   0x9   :  { %313 = vpow2.f32 %v84_v19  ;;  %v138_v30 = vmax.f32 %v135_v20, %v137_v25  ;;  %v141_v31 = vmin.f32 %v139_v24, %v140_v26  ;;  %v309_v36 = vld [vmem:[%s646_s1 + $0x7] sm:$0x1]  ;;  %v194_v37 = vand.u32 2147483647, %v411_v28  ;;  %v434_v39 = vld [vmem:[%s646_s1] sm:$0x1] }
   0xa   :  { %315 = vpow2.f32 %v99_v22  ;;  %v209_v38 = vand.u32 2147483647, %v416_v29  ;;  %v301_v40 = vld [vmem:[%s644_s0 + $0x7] sm:$0x1]  ;;  %v178_v41 = vsub.f32 0.0, %v177_v33  ;;  %v246_v50 = vmul.f32 0.5, %v309_v36 }
   0xb   :  { %317 = vpow2.f32 %v115_v23  ;;  %v424_v34 = vsub.f32 %v141_v31, %v138_v30  ;;  %v225_v42 = vand.u32 2147483647, %v421_v32  ;;  %v308_v44 = vld [vmem:[%s646_s1 + $0x6] sm:$0x1]  ;;  %v195_v45 = vsub.f32 0.0, %v194_v37 }
   0xc   :  { %v210_v46 = vsub.f32 0.0, %v209_v38  ;;  %v447_v47 = vld [vmem:[%s646_s1 + $0x4] sm:$0x1]  ;;  %v179_v48 = vmul.f32 1.442695, %v178_v41  ;;  %v247_v56 = vsub.f32 %v308_v44, %v246_v50  ;;  %v248_v57 = vmul.f32 0.5, %v301_v40 }
   0xd   :  { %v143_v43 = vmax.f32 %v424_v34, 0.0  ;;  %v226_v49 = vsub.f32 0.0, %v225_v42  ;;  %v300_v52 = vld [vmem:[%s644_s0 + $0x6] sm:$0x1]  ;;  %v196_v53 = vmul.f32 1.442695, %v195_v45  ;;  %v251_v58 = vadd.f32 %v308_v44, %v246_v50 }
   0xe   :  { %v211_v54 = vmul.f32 1.442695, %v210_v46  ;;  %319 = vpow2.f32 %v179_v48  ;;  %vm62_vm0 = vcmp.gt.f32.partialorder %v434_v39, 0.0  ;;  %vm174_vm1 = vcmp.gt.f32.partialorder %v447_v47, 0.0  ;;  %v297_v8 = vld [vmem:[%s646_s1 + $0x1] sm:$0x1] }
   0xf   :  { %v145_v51 = vsub.f32 %v144_v35, %v143_v43  ;;  %v227_v55 = vmul.f32 1.442695, %v226_v49  ;;  %321 = vpow2.f32 %v196_v53  ;;  %v249_v60 = vsub.f32 %v300_v52, %v248_v57 }
  0x10   :  { %323 = vpow2.f32 %v211_v54  ;;  %v252_v61 = vadd.f32 %v300_v52, %v248_v57  ;;  %v468_v9 = vsel %vm62_vm0, 1.0, %v347_v0  ;;  %v474_v11 = vsel %vm174_vm1, 1.0, %v347_v0  ;;  %v279_v0 = vld [vmem:[%s645_s2 + $0x3] sm:$0x1] }
  0x11   :  { %v146_v59 = vadd.f32 1e-06, %v145_v51  ;;  %325 = vpow2.f32 %v227_v55  ;;  %v250_v5 = vmax.f32 %v247_v56, %v249_v60  ;;  %v256_v17 = vadd.f32 %v309_v36, %v301_v40 }
  0x12   :  { %v253_v6 = vmin.f32 %v251_v58, %v252_v61  ;;  %v269_v18 = vadd.f32 %v474_v11, %v468_v9  ;;  %vm129_vm2 = vcmp.lt.f32.partialorder %v297_v8, 1.5  ;;  %vm128_vm3 = vcmp.lt.f32.partialorder %v297_v8, 0.5 }
  0x13   :  { %327 = vrcp.f32 %v146_v59  ;;  %v130_v21 = vsel %vm129_vm2, %v380_v3, %v385_v4  ;;  %v64_v24 = vmax.f32 %v370_v1, 0.0  ;;  %v497_v25 = vmul.f32 %v370_v1, %v434_v39 }
  0x14   :  { %v479_v14 = vsub.f32 %v253_v6, %v250_v5  ;;  %v280_v23 = vadd.f32 %v279_v0, %v269_v18  ;;  %v81_v31 = vmax.f32 %v375_v2, 0.0  ;;  %v96_v33 = vmax.f32 %v380_v3, 0.0 }
  0x15   :  { %v456_v62 = vpop.eup %311  ;;  %v112_v38 = vmax.f32 %v385_v4, 0.0  ;;  %v513_v40 = vsel %vm128_vm3, %v375_v2, %v130_v21  ;;  %v529_v54 = vmul.f32 %v447_v47, %v406_v27  ;;  %v176_v60 = vmax.f32 %v406_v27, 0.0  ;;  %v270_v27 = vld [vmem:[%s645_s2] sm:$0x1] }
  0x16   :  { %v458_v63 = vpop.eup %313  ;;  %v69_v15 = vadd.f32 1.0, %v456_v62  ;;  %v255_v19 = vmax.f32 %v479_v14, 0.0  ;;  %281 = vst [vmem:[%s645_s2 + $0x3] sm:$0x1] %v280_v23  ;;  %v72_v41 = vmul.f32 -0.5, %v456_v62 }
  0x17   :  { %v460_v7 = vpop.eup %315  ;;  %v86_v10 = vadd.f32 1.0, %v458_v63  ;;  %v89_v20 = vmul.f32 -0.5, %v458_v63  ;;  %v92_v45 = vand.u32 2147483647, %v458_v63  ;;  %v75_v53 = vand.u32 2147483647, %v456_v62 }
  0x18   :  { %v476_v12 = vpop.eup %317  ;;  %v101_v13 = vadd.f32 1.0, %v460_v7  ;;  %v257_v22 = vsub.f32 %v256_v17, %v255_v19  ;;  %v104_v26 = vmul.f32 -0.5, %v460_v7  ;;  %v107_v49 = vand.u32 2147483647, %v460_v7 }
  0x19   :  { %329 = vlog2.f32 %v86_v10  ;;  %v117_v16 = vadd.f32 1.0, %v476_v12  ;;  %v120_v35 = vmul.f32 -0.5, %v476_v12  ;;  %v90_v44 = vadd.f32 1.0, %v89_v20 }
  0x1a   :  { %331 = vlog2.f32 %v101_v13  ;;  %v258_v36 = vadd.f32 1e-06, %v257_v22  ;;  %v105_v48 = vadd.f32 1.0, %v104_v26  ;;  %v123_v52 = vand.u32 2147483647, %v476_v12 }
  0x1b   :  { %333 = vlog2.f32 %v117_v16  ;;  %v500_v30 = vpop.eup %319  ;;  %v121_v51 = vadd.f32 1.0, %v120_v35  ;;  %v73_v56 = vadd.f32 1.0, %v72_v41  ;;  %v91_v58 = vmul.f32 %v458_v63, %v90_v44 }
  0x1c   :  { %335 = vlog2.f32 %v69_v15  ;;  %v508_v37 = vpop.eup %321  ;;  %v181_v42 = vadd.f32 1.0, %v500_v30  ;;  %vm533_vm4 = vcmp.lt.f32.partialorder %v92_v45, 0.0004427343  ;;  %v106_v6 = vmul.f32 %v460_v7, %v105_v48 }
  0x1d   :  { %v517_v3 = vpop.eup %323  ;;  %v198_v46 = vadd.f32 1.0, %v508_v37  ;;  %337 = vrcp.f32 %v258_v36  ;;  %v201_v61 = vmul.f32 -0.5, %v508_v37  ;;  %vm540_vm5 = vcmp.lt.f32.partialorder %v107_v49, 0.0004427343 }
  0x1e   :  { %v213_v50 = vadd.f32 1.0, %v517_v3  ;;  %339 = vlog2.f32 %v181_v42  ;;  %v523_v2 = vpop.eup %325  ;;  %v184_v10 = vmul.f32 -0.5, %v500_v30  ;;  %v122_v15 = vmul.f32 %v476_v12, %v121_v51 }
  0x1f   :  { %341 = vlog2.f32 %v198_v46  ;;  %v229_v55 = vadd.f32 1.0, %v523_v2  ;;  %vm546_vm6 = vcmp.lt.f32.partialorder %v123_v52, 0.0004427343  ;;  %vm550_vm7 = vcmp.lt.f32.partialorder %v75_v53, 0.0004427343 }
  0x20   :  { %343 = vlog2.f32 %v213_v50  ;;  %v328_v57 = vpop.eup %327  ;;  %v216_v0 = vmul.f32 -0.5, %v517_v3  ;;  %v74_v20 = vmul.f32 %v456_v62, %v73_v56  ;;  %v187_v21 = vand.u32 2147483647, %v500_v30 }
  0x21   :  { %345 = vlog2.f32 %v229_v55  ;;  %v148_v26 = vmul.f32 %v328_v57, %v143_v43  ;;  %v202_v35 = vadd.f32 1.0, %v201_v61  ;;  %v232_v41 = vmul.f32 -0.5, %v523_v2  ;;  %v307_v55 = vld [vmem:[%s646_s1 + $0x5] sm:$0x1] }
  0x22   :  { %v185_v44 = vadd.f32 1.0, %v184_v10  ;;  %v193_v46 = vmax.f32 %v411_v28, 0.0  ;;  %v204_v48 = vand.u32 2147483647, %v508_v37  ;;  %v217_v50 = vadd.f32 1.0, %v216_v0 }
  0x23   :  { %v219_v34 = vand.u32 2147483647, %v517_v3  ;;  %v149_v51 = vsel %vm62_vm0, %v148_v26, 0.0  ;;  %v208_v52 = vmax.f32 %v416_v29, 0.0  ;;  %v203_v56 = vmul.f32 %v508_v37, %v202_v35  ;;  %v276_v37 = vld [vmem:[%s645_s2 + $0x2] sm:$0x1] }
  0x24   :  { %v233_v57 = vadd.f32 1.0, %v232_v41  ;;  %vm581_vm8 = vcmp.lt.f32.partialorder %v187_v21, 0.0004427343  ;;  %vm594_vm9 = vcmp.lt.f32.partialorder %v204_v48, 0.0004427343  ;;  %vm241_vm12 = vcmp.lt.f32.partialorder %v307_v55, 1.5 }
  0x25   :  { %vm599_vm10 = vcmp.lt.f32.partialorder %v219_v34, 0.0004427343  ;;  %vm240_vm13 = vcmp.lt.f32.partialorder %v307_v55, 0.5 }
  0x26   :  { %v330_v5 = vpop.eup %329 }
  0x27   :  { %v332_v13 = vpop.eup %331  ;;  %v88_v63 = vmul.f32 0.6931472, %v330_v5 }
  0x28   :  { %v334_v7 = vpop.eup %333  ;;  %v103_v18 = vmul.f32 0.6931472, %v332_v13  ;;  %v218_v13 = vmul.f32 %v517_v3, %v217_v50 }
  0x29   :  { %v336_v22 = vpop.eup %335  ;;  %v94_v12 = vsel %vm533_vm4, %v91_v58, %v88_v63  ;;  %v119_v23 = vmul.f32 0.6931472, %v334_v7  ;;  %v186_v58 = vmul.f32 %v500_v30, %v185_v44 }
  0x2a   :  { %v109_v36 = vsel %vm540_vm5, %v106_v6, %v103_v18  ;;  %v71_v42 = vmul.f32 0.6931472, %v336_v22  ;;  %v95_v45 = vadd.f32 %v94_v12, %v81_v31  ;;  %v224_v31 = vmax.f32 %v421_v32, 0.0  ;;  %v338_v53 = vpop.eup %337 }
  0x2b   :  { %v110_v62 = vadd.f32 %v109_v36, %v96_v33  ;;  %v125_v49 = vsel %vm546_vm6, %v122_v15, %v119_v23  ;;  %v235_v33 = vand.u32 2147483647, %v523_v2  ;;  %v340_v39 = vpop.eup %339  ;;  %v260_v6 = vmul.f32 %v338_v53, %v255_v19 }
  0x2c   :  { %v77_v43 = vsel %vm550_vm7, %v74_v20, %v71_v42  ;;  %v126_v5 = vadd.f32 %v125_v49, %v112_v38  ;;  %v342_v30 = vpop.eup %341  ;;  %v183_v14 = vmul.f32 0.6931472, %v340_v39  ;;  %v234_v15 = vmul.f32 %v523_v2, %v233_v57 }
  0x2d   :  { %v111_v61 = vadd.f32 %v110_v62, %v95_v45  ;;  %v78_v8 = vadd.f32 %v77_v43, %v64_v24  ;;  %v344_v19 = vpop.eup %343  ;;  %v200_v38 = vmul.f32 0.6931472, %v342_v30  ;;  %vm603_vm11 = vcmp.lt.f32.partialorder %v235_v33, 0.0004427343 }
  0x2e   :  { %v261_v24 = vsel %vm174_vm1, %v260_v6, 0.0  ;;  %v215_v63 = vmul.f32 0.6931472, %v344_v19  ;;  %v189_v3 = vsel %vm581_vm8, %v186_v58, %v183_v14  ;;  %v346_v17 = vpop.eup %345  ;;  %v242_v23 = vsel %vm241_vm12, %v416_v29, %v421_v32 }
  0x2f   :  { %v268_v16 = vadd.f32 %v261_v24, %v149_v51  ;;  %v127_v7 = vadd.f32 %v126_v5, %v111_v61  ;;  %v206_v18 = vsel %vm594_vm9, %v203_v56, %v200_v38  ;;  %v80_v0 = vsub.f32 %v78_v8, %v497_v25 }
  0x30   :  { %v190_v20 = vadd.f32 %v189_v3, %v176_v60  ;;  %v207_v21 = vadd.f32 %v206_v18, %v193_v46  ;;  %v221_v47 = vsel %vm599_vm10, %v218_v13, %v215_v63  ;;  %v231_v22 = vmul.f32 0.6931472, %v346_v17 }
  0x31   :  { %v277_v2 = vadd.f32 %v276_v37, %v268_v16  ;;  %v222_v12 = vadd.f32 %v221_v47, %v208_v52  ;;  %v132_v60 = vsub.f32 %v127_v7, %v513_v40  ;;  %v243_v29 = vsel %vm240_vm13, %v411_v28, %v242_v23  ;;  %v273_v40 = vld [vmem:[%s645_s2 + $0x1] sm:$0x1] }
  0x32   :  { %v192_v26 = vsub.f32 %v190_v20, %v529_v54  ;;  %v237_v25 = vsel %vm603_vm11, %v234_v15, %v231_v22 }
  0x33   :  { %278 = vst [vmem:[%s645_s2 + $0x2] sm:$0x1] %v277_v2  ;;  %v223_v35 = vadd.f32 %v222_v12, %v207_v21  ;;  %v238_v36 = vadd.f32 %v237_v25, %v224_v31  ;;  %v133_v42 = vmul.f32 %v132_v60, %v468_v9 }
  0x34   :  { %v266_v41 = vadd.f32 %v192_v26, %v80_v0 }
  0x35   :  { %v239_v32 = vadd.f32 %v238_v36, %v223_v35 }
  0x36   :  { %v271_v54 = vadd.f32 %v270_v27, %v266_v41 }
  0x37   :  { %v244_v44 = vsub.f32 %v239_v32, %v243_v29 }
  0x38   :  { %272 = vst [vmem:[%s645_s2] sm:$0x1] %v271_v54 }
  0x39   :  { %v245_v45 = vmul.f32 %v244_v44, %v474_v11 }
  0x3b   :  { %v267_v62 = vadd.f32 %v245_v45, %v133_v42 }
  0x3d   :  { %v274_v46 = vadd.f32 %v273_v40, %v267_v62 }
  0x3f   :  { %275 = vst [vmem:[%s645_s2 + $0x1] sm:$0x1] %v274_v46 }

</bundles_post_ra>
